<compile_context>
chip_gen: v6e
topology: v6e:2x2x1
jax: 0.10.0
libtpu: 0.0.40
codegen_flags: <defaults>
</compile_context>

<pallas_src>
import functools

import jax
import jax.numpy as jnp
from jax.experimental import pallas as pl
from jax.experimental.pallas import tpu as pltpu


_TARGET_BLOCK_BYTES = 2 * 1024 * 1024  # ~2 MiB per block (input block == output block size)


def _divine_kernel(x_ref, o_ref, *, divisor):
    x = x_ref[...]
    if x.dtype != o_ref.dtype:          # int -> float promotion happens in-kernel
        x = x.astype(o_ref.dtype)
    o_ref[...] = x / divisor            # weakly-typed scalar: stays in x's dtype


def _run_2d(kernel, x2, out_dtype):
    """Run the elementwise kernel over a (rows, lane) slab, tiled along rows."""
    rows, lane = x2.shape
    itemsize = max(jnp.dtype(x2.dtype).itemsize, jnp.dtype(out_dtype).itemsize)

    # Row tile sized for ~_TARGET_BLOCK_BYTES, multiple of 8 (sublane tiling).
    target_rows = max(8, (_TARGET_BLOCK_BYTES // (lane * itemsize)) // 8 * 8)
    if rows <= 8:
        tile = rows  # single block equal to the full array dims (exempt from 8-row rule)
    else:
        # Keep >=2 grid steps when possible so v7x's two TensorCores both get
        # work and the double-buffered pipeline has something to overlap.
        half8 = max(8, (-(-rows // 2)) // 8 * 8)
        tile = min(target_rows, half8)

    grid = pl.cdiv(rows, tile)  # last block may be partial; Pallas masks the edge.

    return pl.pallas_call(
        kernel,
        out_shape=jax.ShapeDtypeStruct((rows, lane), out_dtype),
        grid=(grid,),
        in_specs=[pl.BlockSpec((tile, lane), lambda i: (i, 0))],
        out_specs=pl.BlockSpec((tile, lane), lambda i: (i, 0)),
        compiler_params=pltpu.CompilerParams(
            dimension_semantics=("parallel",)
        ),
    )(x2)


def divine2(x, num_di=5):
    """Pallas TPU implementation of Divine2.forward: x / num_di."""
    orig_shape = x.shape
    divisor = float(num_di)

    # Match PyTorch true-division dtype semantics: inexact dtypes keep their
    # dtype, integers / bools promote to float32.
    out_dtype = x.dtype if jnp.issubdtype(x.dtype, jnp.inexact) else jnp.dtype(jnp.float32)

    total = int(x.size)
    if total == 0:
        return jnp.zeros(orig_shape, out_dtype)

    flat = x.reshape(-1)  # reshape of a contiguous array: free, no copy
    kernel = functools.partial(_divine_kernel, divisor=divisor)

    # Pick a lane-dense width (multiple of 128) that divides the element count.
    lane = next((c for c in (512, 1024, 256, 128) if total % c == 0), None)

    if lane is not None:
        out = _run_2d(kernel, flat.reshape(total // lane, lane), out_dtype)
        return out.reshape(orig_shape)

    # Rare fallback: element count not divisible by 128.  Push the bulk through
    # the kernel and finish the (<512-element) tail in plain JAX, avoiding a
    # full-array pad + slice round trip.
    lane = 512
    main = (total // lane) * lane
    tail = flat[main:].astype(out_dtype) / divisor
    if main == 0:
        return tail.reshape(orig_shape)
    head = _run_2d(kernel, flat[:main].reshape(main // lane, lane), out_dtype)
    return jnp.concatenate([head.reshape(-1), tail]).reshape(orig_shape)


if __name__ == "__main__":
    key = jax.random.PRNGKey(0)
    num_di = 5

    # Small NCHW input consistent with the module's conv-style usage.
    x_small = jax.random.normal(key, (2, 4, 16, 16), dtype=jnp.float32)
    y_small = jax.block_until_ready(divine2(x_small, num_di=num_di))
    ref_small = x_small / num_di
    assert y_small.shape == x_small.shape and y_small.dtype == x_small.dtype
    assert jnp.allclose(y_small, ref_small, atol=1e-6, rtol=1e-6), "small mismatch"

    # Slightly larger input to exercise the tiled multi-block / partial-edge path.
    x_big = jax.random.normal(jax.random.PRNGKey(1), (4, 8, 56, 56), dtype=jnp.float32)
    y_big = jax.block_until_ready(divine2(x_big, num_di=num_di))
    assert jnp.allclose(y_big, x_big / num_di, atol=1e-6, rtol=1e-6), "big mismatch"

    print("KERNEL_OK")
</pallas_src>

<mosaic_0001>
module attributes {stable_mosaic.version = 11 : i64} {
  func.func @_divine_kernel(%arg0: i32, %arg1: memref<4x512xf32, #tpu.memory_space<vmem>>, %arg2: memref<4x512xf32, #tpu.memory_space<vmem>>) attributes {dimension_semantics = [#tpu.dimension_semantics<parallel>], iteration_bounds = array<i64: 1>, scalar_prefetch = 0 : i64, scratch_operands = 0 : i64, tpu.core_type = #tpu.core_type<tc>, window_params = [{transform_indices = @transform_0, window_bounds = array<i64: 4, 512>}, {transform_indices = @transform_1, window_bounds = array<i64: 4, 512>}]} {
    %c0 = arith.constant 0 : index
    %c0_0 = arith.constant 0 : index
    %0 = vector.load %arg1[%c0, %c0_0] : memref<4x512xf32, #tpu.memory_space<vmem>>, vector<4x512xf32>
    %cst = arith.constant 5.000000e+00 : f32
    %1 = vector.broadcast %cst : f32 to vector<4x512xf32>
    %2 = arith.divf %0, %1 : vector<4x512xf32>
    %c0_1 = arith.constant 0 : index
    %c0_2 = arith.constant 0 : index
    %3 = vector.load %arg2[%c0_1, %c0_2] : memref<4x512xf32, #tpu.memory_space<vmem>>, vector<4x512xf32>
    tpu.vector_store %arg2[%c0_1, %c0_2], %2 {strides = array<i32>} : memref<4x512xf32, #tpu.memory_space<vmem>>, vector<4x512xf32>,
    return
  }
  func.func @transform_0(%arg0: i32) -> (i32, i32) {
    %c0_i32 = arith.constant 0 : i32
    %c0_i32_0 = arith.constant 0 : i32
    return %arg0, %c0_i32 : i32, i32
  }
  func.func @transform_1(%arg0: i32) -> (i32, i32) {
    %c0_i32 = arith.constant 0 : i32
    %c0_i32_0 = arith.constant 0 : i32
    return %arg0, %c0_i32 : i32, i32
  }
}

</mosaic_0001>

<bundles_post_ra>
// kernel: tpu_custom_call.1
= control target key start
LH: loop header
LB: loop body
LE: loop exit
PB: predicated region body
PF: predicated region fallthrough
CT: control target
= control target key end

     0   :  { %6 = vsyncpa [#allocation3], 0  ;;  %s107_s0 = inlined_call_operand.hbm [shape: f32[4,512], index: 0, kind: input, shape index: {}]   ;;  %s108_s1 = inlined_call_operand.hbm [shape: f32[4,512], index: 1, kind: output, shape index: {}]  }
   0x1   :  { %7 = vsyncpa [#allocation4], 0  ;;  %s89_s6 = smov [#allocation2]  }
   0x2   :  { %s14_s7 = sshll.u32 %s89_s6, 4  ;;  %s15_s7 = int_to_ptr.vmem [resolvable:$true] %s14_s7 }
   0x3   :  { %s53_s8 = scalar_lea.vmem %s15_s7, 256  ;;  %p58_p1 = scmp.lt.s32.totalorder %s15_s7, %s15_s7 }
   0x4   :  { %p54_p0 = scmp.ne.s32.totalorder %s15_s7, %s53_s8  ;;  %p59_p2 = scmp.lt.s32.totalorder %s53_s8, %s53_s8 }
   0x6   :  { %p60_p3 = por %p59_p2, %p58_p1 }
   0x8   :  { %p61_p4 = pnand %p60_p3, %p54_p0 }
   0xa   :  { %64 = shalt.err (!%p61_p4)
}
   0xb   :  { %17 = dma.hbm_to_vmem [thread:$0]  %s107_s0, 256, %s15_s7, [#allocation3]  }
   0xc   :  { %85 = dma.done.wait [#allocation3], 256  }
   0xd   :  { %86 = vsyncadd [#allocation3], 4294967040  ;;  %s90_s11 = smov [#allocation5]   ;;  %v21_v0 = vld [vmem:[#allocation2] sm:$0xff]  ;;  %v22_v1 = vld [vmem:[#allocation2 + $0x8] sm:$0xff] }
   0xe   :  { %s34_s12 = sshll.u32 %s90_s11, 4  ;;  %v24_v2 = vmul.f32 0.2, %v21_v0  ;;  %v25_v3 = vmul.f32 0.2, %v22_v1  ;;  %s35_s12 = int_to_ptr.vmem [resolvable:$true] %s34_s12 }
   0xf   :  { %s65_s13 = scalar_lea.vmem %s35_s12, 256  ;;  %p70_p6 = scmp.lt.s32.totalorder %s35_s12, %s35_s12 }
  0x10   :  { %26 = vst [vmem:[#allocation5] sm:$0xff] %v24_v2  ;;  %27 = vst [vmem:[#allocation5 + $0x8] sm:$0xff] %v25_v3  ;;  %p66_p5 = scmp.ne.s32.totalorder %s35_s12, %s65_s13  ;;  %p71_p7 = scmp.lt.s32.totalorder %s65_s13, %s65_s13 }
  0x12   :  { %p72_p8 = por %p71_p7, %p70_p6 }
  0x14   :  { %p73_p9 = pnand %p72_p8, %p66_p5 }
  0x16   :  { %76 = shalt.err (!%p73_p9)
}
  0x17   :  { %37 = dma.vmem_to_hbm [thread:$0]  %s35_s12, 256, %s108_s1, [#allocation4]  }
  0x18   :  { %87 = dma.done.wait [#allocation4], 256  }
  0x19   :  { %88 = vsyncadd [#allocation4], 4294967040 }
  0x1a   :  { %41 = vsyncpa [#allocation3], 1 }
  0x1b   :  { %42 = vsyncpa [#allocation4], 1 }

</bundles_post_ra>
